<compile_context>
chip_gen: v7x
topology: tpu7x:2x2x1
jax: 0.10.0
libtpu: 0.0.40
codegen_flags: <defaults>
</compile_context>

<pallas_src>
import functools

import jax
import jax.numpy as jnp
from jax.experimental import pallas as pl
from jax.experimental.pallas import tpu as pltpu


def _round_up(n, m):
    return ((n + m - 1) // m) * m


def _vmem_capacity_bytes():
    try:
        return int(pltpu.get_tpu_info().vmem_capacity_bytes)
    except Exception:
        return 64 << 20  # conservative fallback (v7x per-TC physical VMEM)


def _pick_n_tile(c4, max_cols):
    """Largest multiple of 128 that divides 4C and is <= max_cols."""
    if c4 <= 128 or c4 % 128 != 0:
        return c4
    best = 128
    t = 128
    limit = min(c4, max(int(max_cols), 128))
    while t <= limit:
        if c4 % t == 0:
            best = t
        t += 128
    return best


# --------------------------------------------------------------------------
# Kernel
# --------------------------------------------------------------------------

def _channel_mix_kernel(xk_ref, wk_ref, wvg_ref, out_ref, *acc_refs,
                        ffn_scale, hidden, use_glu):
    # Up-projection column tile on the MXU (f32 accumulation).
    k = jnp.dot(xk_ref[...], wk_ref[...], preferred_element_type=jnp.float32)
    # relu(k)^2 in f32 on the VPU, cast back to the matmul operand dtype.
    k = jnp.square(jnp.maximum(k, 0.0)).astype(wvg_ref.dtype)
    # Fused down-projection (Wv | Wg) -> [rt, C] or [rt, 2C] partial.
    part = jnp.dot(k, wvg_ref[...], preferred_element_type=jnp.float32)

    def finalize(vg):
        if use_glu:
            v = vg[:, :hidden]
            g = vg[:, hidden:]
            out = v * jax.nn.sigmoid(g)
        else:
            out = vg
        out_ref[...] = (out * ffn_scale).astype(out_ref.dtype)

    if not acc_refs:
        # Single 4C tile (weights fully resident): no accumulator round trip.
        finalize(part)
    else:
        (acc_ref,) = acc_refs
        n = pl.program_id(1)

        @pl.when(n == 0)
        def _():
            acc_ref[...] = jnp.zeros_like(acc_ref)

        acc_ref[...] += part

        @pl.when(n == pl.num_programs(1) - 1)
        def _():
            finalize(acc_ref[...])


# --------------------------------------------------------------------------
# Launch helper
# --------------------------------------------------------------------------

def _launch(xk2d, weights, kernel, *, rt, C, tn, out_cols, out_dtype,
            n_steps, cap, in_isz, out_isz, single_buffer_weights):
    M = xk2d.shape[0]
    C4 = 4 * C
    slack = 4 << 20

    # VMEM budget: double-buffered row tiles in/out, weight residency (single-
    # or double-buffered), intermediate k tile, accumulator scratch.
    io_bytes = 2 * rt * C * in_isz + 2 * rt * C * out_isz
    k_bytes = rt * tn * (4 + in_isz)
    if n_steps == 1:
        wbuf = 1 if single_buffer_weights else 2
        w_bytes = wbuf * (C * C4 + C4 * out_cols) * in_isz
        acc_bytes = 0
    else:
        w_bytes = 2 * (C * tn + tn * out_cols) * in_isz
        acc_bytes = rt * out_cols * 4
    vmem_limit = int(min(max(io_bytes + w_bytes + k_bytes + acc_bytes + slack,
                             32 << 20), cap))

    row_spec = pl.BlockSpec((rt, C), lambda i, n: (i, 0))
    out_spec = pl.BlockSpec((rt, C), lambda i, n: (i, 0))

    spec_kwargs = {}
    if single_buffer_weights and n_steps == 1:
        # Constant index_map -> no need to double-buffer the resident weights.
        spec_kwargs = dict(pipeline_mode=pl.Buffered(1))
    wk_spec = pl.BlockSpec((C, tn), lambda i, n: (0, n), **spec_kwargs)
    wvg_spec = pl.BlockSpec((tn, out_cols), lambda i, n: (n, 0), **spec_kwargs)

    scratch = []
    if n_steps > 1:
        scratch = [pltpu.VMEM((rt, out_cols), jnp.float32)]

    return pl.pallas_call(
        kernel,
        out_shape=jax.ShapeDtypeStruct((M, C), out_dtype),
        grid_spec=pltpu.PrefetchScalarGridSpec(
            num_scalar_prefetch=0,
            grid=(pl.cdiv(M, rt), n_steps),
            in_specs=[row_spec, wk_spec, wvg_spec],
            out_specs=out_spec,
            scratch_shapes=scratch,
        ),
        compiler_params=pltpu.CompilerParams(
            dimension_semantics=("parallel", "arbitrary"),
            vmem_limit_bytes=vmem_limit,
        ),
    )(xk2d, *weights)


# --------------------------------------------------------------------------
# Wrapper
# --------------------------------------------------------------------------

def rwkv_channel_mix_forward(
    x,
    params,
    state=None,
    *,
    ffn_scale=1.0,
    use_glu=True,
    row_tile=256,
    n_tile=None,
    compute_dtype=jnp.bfloat16,
    out_dtype=None,
):
    """x: [B, T, C], state: optional [B, C].

    Returns (output [B, T, C] (out_dtype, default x.dtype), new_state [B, C])."""
    B, T, C = x.shape
    C4 = 4 * C
    out_cols = 2 * C if use_glu else C
    if state is None:
        state = jnp.zeros((B, C), x.dtype)
    if out_dtype is None:
        out_dtype = x.dtype

    # Time shift + time-mix; the compute_dtype cast fuses into the same XLA
    # producer (no extra f32 [M, C] materialization).
    x_mix = jnp.concatenate([state[:, None, :], x[:, :-1, :]], axis=1)
    tmk = params["time_mix_k"]                       # [1, 1, C]
    xk = (x * tmk + x_mix * (1.0 - tmk)).astype(compute_dtype)
    # NOTE: time_mix_r exists in the PyTorch module but is unused in forward().

    M = B * T
    xk2d = xk.reshape(M, C)

    # Row tile: multiple of 16 for bf16 (sublane packing), 8 for f32; fall back
    # to a full-dim block for tiny M.  Ragged last block handled by Pallas.
    align = 16 if jnp.dtype(compute_dtype).itemsize == 2 else 8
    rt = min(_round_up(row_tile, align), _round_up(M, align))
    if rt > M:
        rt = M

    # Weight prep: [in, out] layout, fused down-projection [4C, 2C] (or [4C, C]).
    w_k = params["w_key"].astype(compute_dtype)                   # [C, 4C]
    if use_glu:
        w_vg = jnp.concatenate(
            [params["w_value"], params["w_gate"]], axis=1).astype(compute_dtype)
    else:
        w_vg = params["w_value"].astype(compute_dtype)            # [4C, C]

    in_isz = jnp.dtype(compute_dtype).itemsize
    out_isz = jnp.dtype(out_dtype).itemsize
    cap = max(32 << 20, _vmem_capacity_bytes() * 7 // 8)          # per-generation cap
    slack = 4 << 20

    # Choose the 4C tile: full residency if it fits the budget, else the
    # largest multiple of 128 dividing 4C that fits with double-buffered tiles.
    io_bytes = 2 * rt * C * in_isz + 2 * rt * C * out_isz
    full_w_bytes = (C * C4 + C4 * out_cols) * in_isz              # single-buffered
    resident_total = io_bytes + full_w_bytes + rt * C4 * (4 + in_isz) + slack
    if n_tile is not None:
        tn = min(int(n_tile), C4)
        if C4 % tn != 0 or (tn % 128 != 0 and tn != C4):
            tn = _pick_n_tile(C4, tn)
    elif resident_total <= cap:
        tn = C4
    else:
        acc_bytes = rt * out_cols * 4
        per_col = 2 * (C + out_cols) * in_isz + rt * (4 + in_isz)
        avail = max(cap - io_bytes - acc_bytes - slack, per_col * 128)
        tn = _pick_n_tile(C4, avail // per_col)
    n_steps = C4 // tn

    kernel = functools.partial(
        _channel_mix_kernel,
        ffn_scale=float(ffn_scale), hidden=C, use_glu=use_glu)

    launch = functools.partial(
        _launch, xk2d, [w_k, w_vg], kernel,
        rt=rt, C=C, tn=tn, out_cols=out_cols, out_dtype=out_dtype,
        n_steps=n_steps, cap=cap, in_isz=in_isz, out_isz=out_isz)

    try:
        out2d = launch(single_buffer_weights=True)
    except Exception:
        # Fallback if pipeline_mode=pl.Buffered(1) is rejected by this jax/Mosaic
        # version: default double-buffered weights (correct, slightly more VMEM).
        out2d = launch(single_buffer_weights=False)

    output = out2d.reshape(B, T, C)
    new_state = x[:, -1]
    return output, new_state


# --------------------------------------------------------------------------
# Parameter init (mirrors the PyTorch module) and a pure-JAX reference
# --------------------------------------------------------------------------

def init_params(key, hidden_size, layer_id=0, use_glu=True):
    """Weights stored as [in_features, out_features] (transposed vs PyTorch)."""
    std = 0.02 * (layer_id + 1)
    k1, k2, k3 = jax.random.split(key, 3)
    H = hidden_size
    p = dict(
        time_mix_k=jnp.ones((1, 1, H), jnp.float32),
        time_mix_r=jnp.ones((1, 1, H), jnp.float32),   # present in module, unused in forward
        w_key=(std * jax.random.normal(k1, (H, 4 * H))).astype(jnp.float32),
        w_value=(std * jax.random.normal(k2, (4 * H, H))).astype(jnp.float32),
    )
    if use_glu:
        p["w_gate"] = (std * jax.random.normal(k3, (4 * H, H))).astype(jnp.float32)
    return p


def _reference_forward(x, params, state=None, *, ffn_scale=1.0, use_glu=True):
    B, T, C = x.shape
    if state is None:
        state = jnp.zeros((B, C), x.dtype)
    x_mix = jnp.concatenate([state[:, None, :], x[:, :-1, :]], axis=1)
    tmk = params["time_mix_k"]
    xk = x * tmk + x_mix * (1.0 - tmk)
    k = xk @ params["w_key"]
    k = jnp.square(jnp.maximum(k, 0.0))
    v = k @ params["w_value"]
    if use_glu:
        g = k @ params["w_gate"]
        out = v * jax.nn.sigmoid(g)
    else:
        out = v
    return out * ffn_scale, x[:, -1]


# --------------------------------------------------------------------------
# Self-test
# --------------------------------------------------------------------------

if __name__ == "__main__":
    key = jax.random.PRNGKey(0)

    # 1) Default path: bf16 operands, f32 accumulation, resident weights.
    B, T, C = 2, 8, 32
    kx, kp, ks, k2 = jax.random.split(key, 4)
    x = jax.random.normal(kx, (B, T, C), jnp.float32)
    params = init_params(kp, C, layer_id=0, use_glu=True)
    state = jax.random.normal(ks, (B, C), jnp.float32)

    out, new_state = rwkv_channel_mix_forward(x, params, state, use_glu=True)
    out = jax.block_until_ready(out)
    new_state = jax.block_until_ready(new_state)
    ref_out, ref_state = _reference_forward(x, params, state, use_glu=True)
    assert out.shape == (B, T, C) and new_state.shape == (B, C)
    assert jnp.allclose(out, ref_out, atol=2e-3, rtol=5e-2)
    assert jnp.allclose(new_state, ref_state)

    # 2) f32 path, tight tolerance; non-trivial time-mix (state actually used).
    p2 = dict(params)
    p2["time_mix_k"] = jnp.full((1, 1, C), 0.5, jnp.float32)
    out32, _ = rwkv_channel_mix_forward(
        x, p2, state, use_glu=True, compute_dtype=jnp.float32)
    out32 = jax.block_until_ready(out32)
    r32, _ = _reference_forward(x, p2, state, use_glu=True)
    assert jnp.allclose(out32, r32, atol=1e-5, rtol=1e-5)

    # 3) Non-GLU branch with ffn_scale != 1.
    out_ng, _ = rwkv_channel_mix_forward(
        x, p2, state, use_glu=False, compute_dtype=jnp.float32, ffn_scale=0.5)
    out_ng = jax.block_until_ready(out_ng)
    r_ng, _ = _reference_forward(x, p2, state, use_glu=False, ffn_scale=0.5)
    assert jnp.allclose(out_ng, r_ng, atol=1e-5, rtol=1e-5)

    # 4) Reduction-tiled 4C path + ragged last row block (M=40, rt=16, 4 n-steps).
    B2, T2, C2 = 2, 20, 128
    kx2, kp2, ks2 = jax.random.split(k2, 3)
    x2 = jax.random.normal(kx2, (B2, T2, C2), jnp.float32)
    params2 = init_params(kp2, C2, layer_id=1, use_glu=True)
    params2["time_mix_k"] = jnp.full((1, 1, C2), 0.25, jnp.float32)
    state2 = jax.random.normal(ks2, (B2, C2), jnp.float32)
    out_t, st_t = rwkv_channel_mix_forward(
        x2, params2, state2, use_glu=True, compute_dtype=jnp.float32,
        row_tile=16, n_tile=128, ffn_scale=1.5)
    out_t = jax.block_until_ready(out_t)
    r_t, rs_t = _reference_forward(x2, params2, state2, use_glu=True, ffn_scale=1.5)
    assert jnp.allclose(out_t, r_t, atol=1e-4, rtol=1e-4)
    assert jnp.allclose(st_t, rs_t)

    print("KERNEL_OK")
</pallas_src>

<mosaic_0001>
module attributes {stable_mosaic.version = 11 : i64} {
  func.func @_channel_mix_kernel(%arg0: i32, %arg1: i32, %arg2: memref<16x32xbf16, #tpu.memory_space<vmem>>, %arg3: memref<32x128xbf16, #tpu.memory_space<vmem>>, %arg4: memref<128x64xbf16, #tpu.memory_space<vmem>>, %arg5: memref<16x32xf32, #tpu.memory_space<vmem>>) attributes {dimension_semantics = [#tpu.dimension_semantics<parallel>, #tpu.dimension_semantics<arbitrary>], iteration_bounds = array<i64: 1, 1>, scalar_prefetch = 0 : i64, scratch_operands = 0 : i64, tpu.core_type = #tpu.core_type<tc>, window_params = [{transform_indices = @transform_0, window_bounds = array<i64: 16, 32>}, {pipeline_mode = #tpu.pipeline_mode<synchronous>, transform_indices = @transform_1, window_bounds = array<i64: 32, 128>}, {pipeline_mode = #tpu.pipeline_mode<synchronous>, transform_indices = @transform_2, window_bounds = array<i64: 128, 64>}, {transform_indices = @transform_3, window_bounds = array<i64: 16, 32>}]} {
    %c0 = arith.constant 0 : index
    %c0_0 = arith.constant 0 : index
    %0 = vector.load %arg2[%c0, %c0_0] : memref<16x32xbf16, #tpu.memory_space<vmem>>, vector<16x32xbf16>
    %c0_1 = arith.constant 0 : index
    %c0_2 = arith.constant 0 : index
    %1 = vector.load %arg3[%c0_1, %c0_2] : memref<32x128xbf16, #tpu.memory_space<vmem>>, vector<32x128xbf16>
    %cst = arith.constant dense<0.000000e+00> : vector<16x128xf32>
    %2 = tpu.matmul %0, %1, %cst {dimension_numbers = #tpu.dot_dimension_numbers<[1], [0], [0], [1], [0, 0, 1, 1], [], []>} : vector<16x32xbf16>, vector<32x128xbf16>, vector<16x128xf32> -> vector<16x128xf32>
    %cst_3 = arith.constant 0.000000e+00 : f32
    %3 = vector.broadcast %cst_3 : f32 to vector<16x128xf32>
    %4 = arith.maximumf %2, %3 : vector<16x128xf32>
    %5 = arith.mulf %4, %4 : vector<16x128xf32>
    %6 = arith.truncf %5 : vector<16x128xf32> to vector<16x128xbf16>
    %c0_4 = arith.constant 0 : index
    %c0_5 = arith.constant 0 : index
    %7 = vector.load %arg4[%c0_4, %c0_5] : memref<128x64xbf16, #tpu.memory_space<vmem>>, vector<128x64xbf16>
    %cst_6 = arith.constant dense<0.000000e+00> : vector<16x64xf32>
    %8 = tpu.matmul %6, %7, %cst_6 {dimension_numbers = #tpu.dot_dimension_numbers<[1], [0], [0], [1], [0, 0, 1, 1], [], []>} : vector<16x128xbf16>, vector<128x64xbf16>, vector<16x64xf32> -> vector<16x64xf32>
    %9 = vector.extract_strided_slice %8 {offsets = [0, 0], sizes = [16, 32], strides = [1, 1]} : vector<16x64xf32> to vector<16x32xf32>
    %10 = vector.extract_strided_slice %8 {offsets = [0, 32], sizes = [16, 32], strides = [1, 1]} : vector<16x64xf32> to vector<16x32xf32>
    %11 = arith.negf %10 : vector<16x32xf32>
    %12 = math.exp %11 : vector<16x32xf32>
    %cst_7 = arith.constant 1.000000e+00 : f32
    %13 = vector.broadcast %cst_7 : f32 to vector<16x32xf32>
    %14 = arith.addf %13, %12 : vector<16x32xf32>
    %15 = arith.divf %13, %14 : vector<16x32xf32>
    %16 = arith.mulf %9, %15 : vector<16x32xf32>
    %cst_8 = arith.constant 1.000000e+00 : f32
    %17 = vector.broadcast %cst_8 : f32 to vector<16x32xf32>
    %18 = arith.mulf %16, %17 : vector<16x32xf32>
    %c0_9 = arith.constant 0 : index
    %c0_10 = arith.constant 0 : index
    %19 = vector.load %arg5[%c0_9, %c0_10] : memref<16x32xf32, #tpu.memory_space<vmem>>, vector<16x32xf32>
    tpu.vector_store %arg5[%c0_9, %c0_10], %18 {strides = array<i32>} : memref<16x32xf32, #tpu.memory_space<vmem>>, vector<16x32xf32>,
    return
  }
  func.func @transform_0(%arg0: i32, %arg1: i32) -> (i32, i32) {
    %c0_i32 = arith.constant 0 : i32
    %c0_i32_0 = arith.constant 0 : i32
    return %arg0, %c0_i32 : i32, i32
  }
  func.func @transform_1(%arg0: i32, %arg1: i32) -> (i32, i32) {
    %c0_i32 = arith.constant 0 : i32
    %c0_i32_0 = arith.constant 0 : i32
    return %c0_i32, %arg1 : i32, i32
  }
  func.func @transform_2(%arg0: i32, %arg1: i32) -> (i32, i32) {
    %c0_i32 = arith.constant 0 : i32
    %c0_i32_0 = arith.constant 0 : i32
    return %arg1, %c0_i32 : i32, i32
  }
  func.func @transform_3(%arg0: i32, %arg1: i32) -> (i32, i32) {
    %c0_i32 = arith.constant 0 : i32
    %c0_i32_0 = arith.constant 0 : i32
    return %arg0, %c0_i32 : i32, i32
  }
}

module attributes {stable_mosaic.version = 11 : i64} {
  func.func @_channel_mix_kernel(%arg0: i32, %arg1: i32, %arg2: memref<16x32xbf16, #tpu.memory_space<vmem>>, %arg3: memref<32x128xbf16, #tpu.memory_space<vmem>>, %arg4: memref<128x64xbf16, #tpu.memory_space<vmem>>, %arg5: memref<16x32xf32, #tpu.memory_space<vmem>>) attributes {dimension_semantics = [#tpu.dimension_semantics<parallel>, #tpu.dimension_semantics<arbitrary>], iteration_bounds = array<i64: 1, 1>, scalar_prefetch = 0 : i64, scratch_operands = 0 : i64, tpu.core_type = #tpu.core_type<tc>, window_params = [{transform_indices = @transform_0, window_bounds = array<i64: 16, 32>}, {transform_indices = @transform_1, window_bounds = array<i64: 32, 128>}, {transform_indices = @transform_2, window_bounds = array<i64: 128, 64>}, {transform_indices = @transform_3, window_bounds = array<i64: 16, 32>}]} {
    %c0 = arith.constant 0 : index
    %c0_0 = arith.constant 0 : index
    %0 = vector.load %arg2[%c0, %c0_0] : memref<16x32xbf16, #tpu.memory_space<vmem>>, vector<16x32xbf16>
    %c0_1 = arith.constant 0 : index
    %c0_2 = arith.constant 0 : index
    %1 = vector.load %arg3[%c0_1, %c0_2] : memref<32x128xbf16, #tpu.memory_space<vmem>>, vector<32x128xbf16>
    %cst = arith.constant dense<0.000000e+00> : vector<16x128xf32>
    %2 = tpu.matmul %0, %1, %cst {dimension_numbers = #tpu.dot_dimension_numbers<[1], [0], [0], [1], [0, 0, 1, 1], [], []>} : vector<16x32xbf16>, vector<32x128xbf16>, vector<16x128xf32> -> vector<16x128xf32>
    %cst_3 = arith.constant 0.000000e+00 : f32
    %3 = vector.broadcast %cst_3 : f32 to vector<16x128xf32>
    %4 = arith.maximumf %2, %3 : vector<16x128xf32>
    %5 = arith.mulf %4, %4 : vector<16x128xf32>
    %6 = arith.truncf %5 : vector<16x128xf32> to vector<16x128xbf16>
    %c0_4 = arith.constant 0 : index
    %c0_5 = arith.constant 0 : index
    %7 = vector.load %arg4[%c0_4, %c0_5] : memref<128x64xbf16, #tpu.memory_space<vmem>>, vector<128x64xbf16>
    %cst_6 = arith.constant dense<0.000000e+00> : vector<16x64xf32>
    %8 = tpu.matmul %6, %7, %cst_6 {dimension_numbers = #tpu.dot_dimension_numbers<[1], [0], [0], [1], [0, 0, 1, 1], [], []>} : vector<16x128xbf16>, vector<128x64xbf16>, vector<16x64xf32> -> vector<16x64xf32>
    %9 = vector.extract_strided_slice %8 {offsets = [0, 0], sizes = [16, 32], strides = [1, 1]} : vector<16x64xf32> to vector<16x32xf32>
    %10 = vector.extract_strided_slice %8 {offsets = [0, 32], sizes = [16, 32], strides = [1, 1]} : vector<16x64xf32> to vector<16x32xf32>
    %11 = arith.negf %10 : vector<16x32xf32>
    %12 = math.exp %11 : vector<16x32xf32>
    %cst_7 = arith.constant 1.000000e+00 : f32
    %13 = vector.broadcast %cst_7 : f32 to vector<16x32xf32>
    %14 = arith.addf %13, %12 : vector<16x32xf32>
    %15 = arith.divf %13, %14 : vector<16x32xf32>
    %16 = arith.mulf %9, %15 : vector<16x32xf32>
    %cst_8 = arith.constant 1.000000e+00 : f32
    %17 = vector.broadcast %cst_8 : f32 to vector<16x32xf32>
    %18 = arith.mulf %16, %17 : vector<16x32xf32>
    %c0_9 = arith.constant 0 : index
    %c0_10 = arith.constant 0 : index
    %19 = vector.load %arg5[%c0_9, %c0_10] : memref<16x32xf32, #tpu.memory_space<vmem>>, vector<16x32xf32>
    tpu.vector_store %arg5[%c0_9, %c0_10], %18 {strides = array<i32>} : memref<16x32xf32, #tpu.memory_space<vmem>>, vector<16x32xf32>,
    return
  }
  func.func @transform_0(%arg0: i32, %arg1: i32) -> (i32, i32) {
    %c0_i32 = arith.constant 0 : i32
    %c0_i32_0 = arith.constant 0 : i32
    return %arg0, %c0_i32 : i32, i32
  }
  func.func @transform_1(%arg0: i32, %arg1: i32) -> (i32, i32) {
    %c0_i32 = arith.constant 0 : i32
    %c0_i32_0 = arith.constant 0 : i32
    return %c0_i32, %arg1 : i32, i32
  }
  func.func @transform_2(%arg0: i32, %arg1: i32) -> (i32, i32) {
    %c0_i32 = arith.constant 0 : i32
    %c0_i32_0 = arith.constant 0 : i32
    return %arg1, %c0_i32 : i32, i32
  }
  func.func @transform_3(%arg0: i32, %arg1: i32) -> (i32, i32) {
    %c0_i32 = arith.constant 0 : i32
    %c0_i32_0 = arith.constant 0 : i32
    return %arg0, %c0_i32 : i32, i32
  }
}

</mosaic_0001>

<bundles_post_ra>
// kernel: tpu_custom_call.1
= control target key start
LH: loop header
LB: loop body
LE: loop exit
PB: predicated region body
PF: predicated region fallthrough
CT: control target
= control target key end

     0   :  { %v337_v1 = vmov 0.0   ;;  %vm338_vm0 = vmmov 0   ;;  %vm39_vm1 = vcmask 261120   ;;  %s411_s0 = inlined_call_operand.vmem [shape: bf16[16,32], index: 0, kind: input, shape index: {}]   ;;  %s412_s1 = inlined_call_operand.vmem [shape: bf16[32,128], index: 1, kind: input, shape index: {}]   ;;  %s413_s2 = inlined_call_operand.vmem [shape: bf16[128,64], index: 2, kind: input, shape index: {}]   ;;  %s414_s3 = inlined_call_operand.hbm [shape: f32[16,32], index: 3, kind: output, shape index: {}]  }
   0x1   :  { %v294_v0 = vld [vmem:[%s412_s1] sm:$0xff]   ;;  %260 = vmatprep.subr.bf16.mxu0 %v337_v1  ;;  %268 = vmatprep.subr.bf16.mxu1 %v337_v1  ;;  %v295_v2 = vld [vmem:[%s412_s1 + $0x8] sm:$0xff]   ;;  %v299_v6 = vld [vmem:[%s413_s2 + $0x10] sm:$0xff]  }
   0x2   :  { %261 = vmatpush3.bf16.msra.mxu0 %v294_v0  ;;  %264 = vmatprep.mubr.msk.bf16.mxu0 %vm338_vm0, %v337_v1  ;;  %v297_v3 = vld [vmem:[%s413_s2] sm:$0xff]   ;;  %v298_v5 = vld [vmem:[%s413_s2 + $0x8] sm:$0xff]  }
   0x3   :  { %262 = vmatprep.subr.bf16.mxu0 %v337_v1  ;;  %284 = vmatprep.mubr.msk.bf16.mxu1 %vm338_vm0, %v337_v1  ;;  %v296_v4 = vld [vmem:[%s411_s0] sm:$0xff]  }
   0x4   :  { %269 = vmatpush3.bf16.msra.mxu1 %v297_v3 }
   0x5   :  { %270 = vmatprep.subr.bf16.mxu1 %v337_v1 }
   0x6   :  { %263 = vmatpush3.bf16.msra.mxu0 %v295_v2 }
   0x8   :  { %271 = vmatpush3.bf16.msra.mxu1 %v298_v5 }
   0x9   :  { %265 = vmatmul.mubr.msk.bf16.vlgmr.msra.gmra.mrb[0].mxu0 %vm39_vm1, %v296_v4  ;;  %272 = vmatprep.subr.bf16.mxu1 %v337_v1 }
   0xa   :  { %8 = vsyncpa [#allocation3], 0  ;;  %v300_v7 = vld [vmem:[%s413_s2 + $0x18] sm:$0xff]   ;;  %v301_v8 = vld [vmem:[%s413_s2 + $0x20] sm:$0xff]   ;;  %s340_s5 = smov [#allocation2]  }
   0xb   :  { %v302_v9 = vld [vmem:[%s413_s2 + $0x28] sm:$0xff]   ;;  %v303_v10 = vld [vmem:[%s413_s2 + $0x30] sm:$0xff]   ;;  %v304_v11 = vld [vmem:[%s413_s2 + $0x38] sm:$0xff]   ;;  %s339_s2 = smov 96   ;;  %s223_s6 = sshll.u32 %s340_s5, 4  ;;  %s224_s6 = int_to_ptr.vmem [resolvable:$true] %s223_s6 }
   0xc   :  { %273 = vmatpush3.bf16.msra.mxu1 %v299_v6  ;;  %s313_s7 = scalar_lea.vmem %s224_s6, 256  ;;  %p318_p1 = scmp.lt.s32.totalorder %s224_s6, %s224_s6 }
   0xd   :  { %274 = vmatprep.subr.bf16.mxu1 %v337_v1  ;;  %p314_p0 = scmp.ne.s32.totalorder %s224_s6, %s313_s7  ;;  %p319_p2 = scmp.lt.s32.totalorder %s313_s7, %s313_s7 }
   0xf   :  { %p320_p3 = por %p319_p2, %p318_p1 }
  0x10   :  { %275 = vmatpush3.bf16.msra.mxu1 %v300_v7 }
  0x11   :  { %276 = vmatprep.subr.bf16.mxu1 %v337_v1  ;;  %p321_p4 = pnand %p320_p3, %p314_p0 }
  0x14   :  { %277 = vmatpush3.bf16.msra.mxu1 %v301_v8 }
  0x15   :  { %278 = vmatprep.subr.bf16.mxu1 %v337_v1 }
  0x18   :  { %279 = vmatpush3.bf16.msra.mxu1 %v302_v9 }
  0x19   :  { %280 = vmatprep.subr.bf16.mxu1 %v337_v1 }
  0x1c   :  { %281 = vmatpush3.bf16.msra.mxu1 %v303_v10 }
  0x1d   :  { %282 = vmatprep.subr.bf16.mxu1 %v337_v1 }
  0x20   :  { %283 = vmatpush3.bf16.msra.mxu1 %v304_v11 }
  0xdc   :  { %v77_v12 = vpop.f32.mrb[0].mxu0 }
  0xdd   :  { %v84_v13 = vmax.f32 %v77_v12, 0.0  ;;  %v266_v14 = vpop.f32.mrb[1].mxu0 }
  0xde   :  { %v80_v15 = vpop.f32.mrb[2].mxu0 }
  0xdf   :  { %v85_v16 = vmax.f32 %v80_v15, 0.0  ;;  %v267_v17 = vpop.f32.mrb[3].mxu0  ;;  %v86_v18 = vmul.f32 %v84_v13, %v84_v13 }
  0xe1   :  { %v87_v19 = vmul.f32 %v85_v16, %v85_v16 }
  0xe3   :  { %v88_v20 = vpack.c.bf16 %v87_v19, %v86_v18 }
  0xe5   :  { %285 = vmatmul.mubr.bf16.vlgmr.msra.gmra.mrb[0].mxu1 %v88_v20 }
 0x1b8   :  { %v187_v21 = vpop.f32.mrb[0].mxu1 }
 0x1b9   :  { %v246_v22 = vmul.f32 -1.442695, %v187_v21  ;;  %v286_v23 = vpop.f32.mrb[1].mxu1 }
 0x1ba   :  { %v190_v24 = vpop.f32.mrb[2].mxu1 }
 0x1bb   :  { %305 = vpow2.f32 %v246_v22  ;;  %v247_v25 = vmul.f32 -1.442695, %v190_v24  ;;  %v287_v26 = vpop.f32.mrb[3].mxu1 }
 0x1bd   :  { %307 = vpow2.f32 %v247_v25 }
 0x1c5   :  { %v306_v27 = vpop.eup %305 }
 0x1c6   :  { %v200_v28 = vadd.f32 1.0, %v306_v27 }
 0x1c7   :  { %v308_v29 = vpop.eup %307 }
 0x1c8   :  { %309 = vrcp.f32 %v200_v28  ;;  %v201_v30 = vadd.f32 1.0, %v308_v29 }
 0x1ca   :  { %311 = vrcp.f32 %v201_v30 }
 0x1d2   :  { %v310_v31 = vpop.eup %309 }
 0x1d3   :  { %208 = vrot.lane.b32.xlu0 %v310_v31, %s339_s2 }
 0x1d4   :  { %v312_v32 = vpop.eup %311 }
 0x1d7   :  { %210 = vrot.lane.b32.xlu0 %v312_v32, %s339_s2 }
 0x245   :  { %v209_v33 = vpop.permute.xlu0 %208 }
 0x246   :  { %v214_v34 = vmul.f32 %v209_v33, %v187_v21 }
 0x248   :  { %216 = vst.msk [vmem:[#allocation2] sm:$0xff] %vm39_vm1, %v214_v34 }
 0x249   :  { %v211_v35 = vpop.permute.xlu0 %210 }
 0x24a   :  { %v215_v36 = vmul.f32 %v211_v35, %v190_v24 }
 0x24c   :  { %217 = vst.msk [vmem:[#allocation2 + $0x8] sm:$0xff] %vm39_vm1, %v215_v36 }
 0x24d   :  { %324 = shalt.err (!%p321_p4)
}
 0x24e   :  { %s325_s10 = scalar_lea.hbm %s414_s3, 256 }
 0x24f   :  { %p326_p5 = scmp.ne.s32.totalorder %s414_s3, %s325_s10  ;;  %p329_p6 = scmp.lt.u32.totalorder %s325_s10, %s414_s3 }
 0x251   :  { %p331_p7 = pnand %p329_p6, %p326_p5 }
 0x253   :  { %334 = shalt.err (!%p331_p7)
}
 0x254   :  { %s341_s15 = smov 128   ;;  %s342_s16 = smov 8  }
 0x255   :  { %229 = dma.vmem_to_hbm [thread:$0]  %s224_s6, 256, %s414_s3, [#allocation3], %s341_s15, %s341_s15, %s342_s16  }
 0x256   :  { %335 = dma.done.wait [#allocation3], 256  }
 0x257   :  { %336 = vsyncadd [#allocation3], 4294967040 }
 0x258   :  { %233 = vsyncpa [#allocation3], 1 }

// kernel: tpu_custom_call.1
= control target key start
LH: loop header
LB: loop body
LE: loop exit
PB: predicated region body
PF: predicated region fallthrough
CT: control target
= control target key end

     0   :  { %v337_v1 = vmov 0.0   ;;  %vm338_vm0 = vmmov 0   ;;  %vm39_vm1 = vcmask 261120   ;;  %s411_s0 = inlined_call_operand.vmem [shape: bf16[16,32], index: 0, kind: input, shape index: {}]   ;;  %s412_s1 = inlined_call_operand.vmem [shape: bf16[32,128], index: 1, kind: input, shape index: {}]   ;;  %s413_s2 = inlined_call_operand.vmem [shape: bf16[128,64], index: 2, kind: input, shape index: {}]   ;;  %s414_s3 = inlined_call_operand.hbm [shape: f32[16,32], index: 3, kind: output, shape index: {}]  }
   0x1   :  { %v294_v0 = vld [vmem:[%s412_s1] sm:$0xff]   ;;  %260 = vmatprep.subr.bf16.mxu0 %v337_v1  ;;  %268 = vmatprep.subr.bf16.mxu1 %v337_v1  ;;  %v295_v2 = vld [vmem:[%s412_s1 + $0x8] sm:$0xff]   ;;  %v299_v6 = vld [vmem:[%s413_s2 + $0x10] sm:$0xff]  }
   0x2   :  { %261 = vmatpush3.bf16.msra.mxu0 %v294_v0  ;;  %264 = vmatprep.mubr.msk.bf16.mxu0 %vm338_vm0, %v337_v1  ;;  %v297_v3 = vld [vmem:[%s413_s2] sm:$0xff]   ;;  %v298_v5 = vld [vmem:[%s413_s2 + $0x8] sm:$0xff]  }
   0x3   :  { %262 = vmatprep.subr.bf16.mxu0 %v337_v1  ;;  %284 = vmatprep.mubr.msk.bf16.mxu1 %vm338_vm0, %v337_v1  ;;  %v296_v4 = vld [vmem:[%s411_s0] sm:$0xff]  }
   0x4   :  { %269 = vmatpush3.bf16.msra.mxu1 %v297_v3 }
   0x5   :  { %270 = vmatprep.subr.bf16.mxu1 %v337_v1 }
   0x6   :  { %263 = vmatpush3.bf16.msra.mxu0 %v295_v2 }
   0x8   :  { %271 = vmatpush3.bf16.msra.mxu1 %v298_v5 }
   0x9   :  { %265 = vmatmul.mubr.msk.bf16.vlgmr.msra.gmra.mrb[0].mxu0 %vm39_vm1, %v296_v4  ;;  %272 = vmatprep.subr.bf16.mxu1 %v337_v1 }
   0xa   :  { %8 = vsyncpa [#allocation3], 0  ;;  %v300_v7 = vld [vmem:[%s413_s2 + $0x18] sm:$0xff]   ;;  %v301_v8 = vld [vmem:[%s413_s2 + $0x20] sm:$0xff]   ;;  %s340_s5 = smov [#allocation2]  }
   0xb   :  { %v302_v9 = vld [vmem:[%s413_s2 + $0x28] sm:$0xff]   ;;  %v303_v10 = vld [vmem:[%s413_s2 + $0x30] sm:$0xff]   ;;  %v304_v11 = vld [vmem:[%s413_s2 + $0x38] sm:$0xff]   ;;  %s339_s2 = smov 96   ;;  %s223_s6 = sshll.u32 %s340_s5, 4  ;;  %s224_s6 = int_to_ptr.vmem [resolvable:$true] %s223_s6 }
   0xc   :  { %273 = vmatpush3.bf16.msra.mxu1 %v299_v6  ;;  %s313_s7 = scalar_lea.vmem %s224_s6, 256  ;;  %p318_p1 = scmp.lt.s32.totalorder %s224_s6, %s224_s6 }
   0xd   :  { %274 = vmatprep.subr.bf16.mxu1 %v337_v1  ;;  %p314_p0 = scmp.ne.s32.totalorder %s224_s6, %s313_s7  ;;  %p319_p2 = scmp.lt.s32.totalorder %s313_s7, %s313_s7 }
   0xf   :  { %p320_p3 = por %p319_p2, %p318_p1 }
  0x10   :  { %275 = vmatpush3.bf16.msra.mxu1 %v300_v7 }
  0x11   :  { %276 = vmatprep.subr.bf16.mxu1 %v337_v1  ;;  %p321_p4 = pnand %p320_p3, %p314_p0 }
  0x14   :  { %277 = vmatpush3.bf16.msra.mxu1 %v301_v8 }
  0x15   :  { %278 = vmatprep.subr.bf16.mxu1 %v337_v1 }
  0x18   :  { %279 = vmatpush3.bf16.msra.mxu1 %v302_v9 }
  0x19   :  { %280 = vmatprep.subr.bf16.mxu1 %v337_v1 }
  0x1c   :  { %281 = vmatpush3.bf16.msra.mxu1 %v303_v10 }
  0x1d   :  { %282 = vmatprep.subr.bf16.mxu1 %v337_v1 }
  0x20   :  { %283 = vmatpush3.bf16.msra.mxu1 %v304_v11 }
  0xdc   :  { %v77_v12 = vpop.f32.mrb[0].mxu0 }
  0xdd   :  { %v84_v13 = vmax.f32 %v77_v12, 0.0  ;;  %v266_v14 = vpop.f32.mrb[1].mxu0 }
  0xde   :  { %v80_v15 = vpop.f32.mrb[2].mxu0 }
  0xdf   :  { %v85_v16 = vmax.f32 %v80_v15, 0.0  ;;  %v267_v17 = vpop.f32.mrb[3].mxu0  ;;  %v86_v18 = vmul.f32 %v84_v13, %v84_v13 }
  0xe1   :  { %v87_v19 = vmul.f32 %v85_v16, %v85_v16 }
  0xe3   :  { %v88_v20 = vpack.c.bf16 %v87_v19, %v86_v18 }
  0xe5   :  { %285 = vmatmul.mubr.bf16.vlgmr.msra.gmra.mrb[0].mxu1 %v88_v20 }
 0x1b8   :  { %v187_v21 = vpop.f32.mrb[0].mxu1 }
 0x1b9   :  { %v246_v22 = vmul.f32 -1.442695, %v187_v21  ;;  %v286_v23 = vpop.f32.mrb[1].mxu1 }
 0x1ba   :  { %v190_v24 = vpop.f32.mrb[2].mxu1 }
 0x1bb   :  { %305 = vpow2.f32 %v246_v22  ;;  %v247_v25 = vmul.f32 -1.442695, %v190_v24  ;;  %v287_v26 = vpop.f32.mrb[3].mxu1 }
 0x1bd   :  { %307 = vpow2.f32 %v247_v25 }
 0x1c5   :  { %v306_v27 = vpop.eup %305 }
 0x1c6   :  { %v200_v28 = vadd.f32 1.0, %v306_v27 }
 0x1c7   :  { %v308_v29 = vpop.eup %307 }
 0x1c8   :  { %309 = vrcp.f32 %v200_v28  ;;  %v201_v30 = vadd.f32 1.0, %v308_v29 }
 0x1ca   :  { %311 = vrcp.f32 %v201_v30 }
 0x1d2   :  { %v310_v31 = vpop.eup %309 }
 0x1d3   :  { %208 = vrot.lane.b32.xlu0 %v310_v31, %s339_s2 }
 0x1d4   :  { %v312_v32 = vpop.eup %311 }
 0x1d7   :  { %210 = vrot.lane.b32.xlu0 %v312_v32, %s339_s2 }
 0x245   :  { %v209_v33 = vpop.permute.xlu0 %208 }
 0x246   :  { %v214_v34 = vmul.f32 %v209_v33, %v187_v21 }
 0x248   :  { %216 = vst.msk [vmem:[#allocation2] sm:$0xff] %vm39_vm1, %v214_v34 }
 0x249   :  { %v211_v35 = vpop.permute.xlu0 %210 }
 0x24a   :  { %v215_v36 = vmul.f32 %v211_v35, %v190_v24 }
 0x24c   :  { %217 = vst.msk [vmem:[#allocation2 + $0x8] sm:$0xff] %vm39_vm1, %v215_v36 }
 0x24d   :  { %324 = shalt.err (!%p321_p4)
}
 0x24e   :  { %s325_s10 = scalar_lea.hbm %s414_s3, 256 }
 0x24f   :  { %p326_p5 = scmp.ne.s32.totalorder %s414_s3, %s325_s10  ;;  %p329_p6 = scmp.lt.u32.totalorder %s325_s10, %s414_s3 }
 0x251   :  { %p331_p7 = pnand %p329_p6, %p326_p5 }
 0x253   :  { %334 = shalt.err (!%p331_p7)
}
 0x254   :  { %s341_s15 = smov 128   ;;  %s342_s16 = smov 8  }
 0x255   :  { %229 = dma.vmem_to_hbm [thread:$0]  %s224_s6, 256, %s414_s3, [#allocation3], %s341_s15, %s341_s15, %s342_s16  }
 0x256   :  { %335 = dma.done.wait [#allocation3], 256  }
 0x257   :  { %336 = vsyncadd [#allocation3], 4294967040 }
 0x258   :  { %233 = vsyncpa [#allocation3], 1 }

</bundles_post_ra>
